<compile_context>
chip_gen: v5e
topology: v5e:2x2
jax: 0.10.0
libtpu: 0.0.40
codegen_flags: <defaults>
</compile_context>

<pallas_src>
import jax
import jax.numpy as jnp
from jax import lax
from jax.experimental import pallas as pl
from jax.experimental.pallas import tpu as pltpu


_VMEM_LIMIT_BYTES = 48 * 1024 * 1024   # headroom under v7x's 64 MiB physical VMEM
# Tile targets: 256 is fine for v5e/v6e (128 MiB VMEM); on v7x (64 MiB) 128–256
# depending on E/HP.  The picker below only ever shrinks these to divisors.
_TQ_TARGET = 256
_TK_TARGET = 256
_PROJ_ROWS_TARGET = 512


def _pick_tile(n, target):
    """Largest divisor of n that is <= target and a multiple of 8 (TPU sublane
    rule); falls back to the full extent n (always legal) if none exists."""
    if n <= target:
        return n
    for t in range(target, 7, -1):
        if n % t == 0 and t % 8 == 0:
            return t
    return n


# ---------------------------------------------------------------------------
# Kernel 1: fused QKV projection over row tiles of the flattened (B*S, E) input
# ---------------------------------------------------------------------------
def _qkv_proj_kernel(x_ref, wqkv_ref, bqkv_ref, q_ref, k_ref, v_ref):
    hp = q_ref.shape[-1]
    # (tm, E) @ (E, 3*HP) on the MXU, f32 accumulation, f32 bias add.
    qkv = jnp.dot(x_ref[...], wqkv_ref[...],
                  preferred_element_type=jnp.float32) + bqkv_ref[...]
    # Static, 128-lane-aligned slices of the fused result; stored as bf16
    # (halves the HBM round-trip the attention kernel re-reads tile by tile).
    q_ref[...] = qkv[:, 0 * hp:1 * hp].astype(q_ref.dtype)
    k_ref[...] = qkv[:, 1 * hp:2 * hp].astype(k_ref.dtype)
    v_ref[...] = qkv[:, 2 * hp:3 * hp].astype(v_ref.dtype)


# ---------------------------------------------------------------------------
# Kernel 2: flash attention (online softmax; unscaled scores like the module)
# ---------------------------------------------------------------------------
def _flash_attn_kernel(q_ref, k_ref, v_ref, o_ref, m_sc, l_sc, acc_sc):
    ki = pl.program_id(2)

    @pl.when(ki == 0)
    def _():
        m_sc[...] = jnp.full_like(m_sc, -jnp.inf)
        l_sc[...] = jnp.zeros_like(l_sc)
        acc_sc[...] = jnp.zeros_like(acc_sc)

    q = q_ref[0]                                   # (tq, HP) bf16
    k = k_ref[0]                                   # (tk, HP) bf16
    v = v_ref[0]                                   # (tk, HP) bf16

    # scores = q @ k^T without a physical transpose (contract on head axis).
    s = lax.dot_general(q, k, (((1,), (1,)), ((), ())),
                        preferred_element_type=jnp.float32)          # (tq, tk)

    m_prev = m_sc[...]
    m_new = jnp.maximum(m_prev, jnp.max(s, axis=-1, keepdims=True))
    alpha = jnp.exp(m_prev - m_new)                # rescale of running stats
    p = jnp.exp(s - m_new)                         # f32 exp (portable to v5e EUP)
    l_sc[...] = alpha * l_sc[...] + jnp.sum(p, axis=-1, keepdims=True)
    acc_sc[...] = alpha * acc_sc[...] + jnp.dot(
        p.astype(jnp.bfloat16), v, preferred_element_type=jnp.float32)
    m_sc[...] = m_new

    @pl.when(ki == pl.num_programs(2) - 1)
    def _():
        inv_l = pl.reciprocal(l_sc[...], approx=True)   # EUP slot, VPU stays free
        o_ref[0] = (acc_sc[...] * inv_l).astype(o_ref.dtype)


# ---------------------------------------------------------------------------
# Parameter packing (do once at setup time in real use)
# ---------------------------------------------------------------------------
def pack_qkv_params(wq_t, bq, wk_t, bk, wv_t, bv):
    """Fuse + pad + cast the projection parameters.  Hoist this out of the
    hot path: re-doing it per call costs an extra E x 3*HP HBM round-trip."""
    E, H = wq_t.shape
    HP = ((H + 127) // 128) * 128                  # lane-dense padded head dim

    def pad_w(w):   # (E, H) -> (E, HP), zero-padded, bf16 MXU operand
        return jnp.pad(w, ((0, 0), (0, HP - H))).astype(jnp.bfloat16)

    def pad_b(b):   # (1, H) -> (1, HP), zero-padded, f32 (added post-accumulate)
        return jnp.pad(b, ((0, 0), (0, HP - H))).astype(jnp.float32)

    wqkv = jnp.concatenate([pad_w(wq_t), pad_w(wk_t), pad_w(wv_t)], axis=1)
    bqkv = jnp.concatenate([pad_b(bq), pad_b(bk), pad_b(bv)], axis=1)
    return wqkv, bqkv, H, HP


# ---------------------------------------------------------------------------
# Wrappers
# ---------------------------------------------------------------------------
def attention_head_packed(x, wqkv, bqkv, head_dim):
    """x: (B, S, E) f32/bf16; wqkv: (E, 3*HP) bf16; bqkv: (1, 3*HP) f32."""
    B, S, E = x.shape
    HP = wqkv.shape[1] // 3

    # ---- Kernel 1: fused QKV projection over flattened (B*S, E) rows -------
    x2d = x.reshape(B * S, E).astype(jnp.bfloat16)     # bf16: halves input DMA
    tm = _pick_tile(B * S, _PROJ_ROWS_TARGET)
    n_row_tiles = (B * S) // tm

    def run_proj(single_buffer_invariants):
        inv_kw = ({"pipeline_mode": pl.Buffered(1)}
                  if single_buffer_invariants else {})
        return pl.pallas_call(
            _qkv_proj_kernel,
            out_shape=tuple(jax.ShapeDtypeStruct((B * S, HP), jnp.bfloat16)
                            for _ in range(3)),
            grid_spec=pltpu.PrefetchScalarGridSpec(
                num_scalar_prefetch=0,
                grid=(n_row_tiles,),
                in_specs=[
                    pl.BlockSpec((tm, E), lambda i: (i, 0)),
                    # Grid-invariant weight/bias: single-buffered if supported.
                    pl.BlockSpec((E, 3 * HP), lambda i: (0, 0), **inv_kw),
                    pl.BlockSpec((1, 3 * HP), lambda i: (0, 0), **inv_kw),
                ],
                out_specs=tuple(pl.BlockSpec((tm, HP), lambda i: (i, 0))
                                for _ in range(3)),
            ),
            compiler_params=pltpu.CompilerParams(
                dimension_semantics=("parallel",),
                vmem_limit_bytes=_VMEM_LIMIT_BYTES),
        )(x2d, wqkv, bqkv)

    try:
        q2d, k2d, v2d = run_proj(True)
    except Exception:
        # pipeline_mode single-buffering unavailable on this jax build;
        # default double buffering is semantically identical.
        q2d, k2d, v2d = run_proj(False)

    q = q2d.reshape(B, S, HP)
    k = k2d.reshape(B, S, HP)
    v = v2d.reshape(B, S, HP)

    # ---- Kernel 2: tiled flash attention ------------------------------------
    tq = _pick_tile(S, _TQ_TARGET)
    tk = _pick_tile(S, _TK_TARGET)

    out_padded = pl.pallas_call(
        _flash_attn_kernel,
        out_shape=jax.ShapeDtypeStruct((B, S, HP), jnp.float32),
        grid_spec=pltpu.PrefetchScalarGridSpec(
            num_scalar_prefetch=0,
            grid=(B, S // tq, S // tk),
            in_specs=[
                pl.BlockSpec((1, tq, HP), lambda b, qi, ki: (b, qi, 0)),
                pl.BlockSpec((1, tk, HP), lambda b, qi, ki: (b, ki, 0)),
                pl.BlockSpec((1, tk, HP), lambda b, qi, ki: (b, ki, 0)),
            ],
            out_specs=pl.BlockSpec((1, tq, HP), lambda b, qi, ki: (b, qi, 0)),
            scratch_shapes=[
                pltpu.VMEM((tq, 1), jnp.float32),    # running max   m
                pltpu.VMEM((tq, 1), jnp.float32),    # running denom l
                pltpu.VMEM((tq, HP), jnp.float32),   # running numerator acc
            ],
        ),
        compiler_params=pltpu.CompilerParams(
            # batch + q-tile axes parallel (v7x megacore even at B == 1);
            # KV axis is the reduction → "arbitrary".
            dimension_semantics=("parallel", "parallel", "arbitrary"),
            vmem_limit_bytes=_VMEM_LIMIT_BYTES),
    )(q, k, v)

    # Drop the zero-padded head columns (exact zeros by construction).
    return out_padded[:, :, :head_dim]


def attention_head(x, wq_t, bq, wk_t, bk, wv_t, bv):
    """x: (B, S, E); w*_t: (E, H); b*: (1, H). Returns (B, S, H) float32."""
    wqkv, bqkv, H, _ = pack_qkv_params(wq_t, bq, wk_t, bk, wv_t, bv)
    return attention_head_packed(x, wqkv, bqkv, H)


# ---------------------------------------------------------------------------
# References
# ---------------------------------------------------------------------------
def attention_head_ref(x, wq_t, bq, wk_t, bk, wv_t, bv):
    """Pure-f32 semantic reference (mirrors the PyTorch module exactly)."""
    q = x @ wq_t + bq
    k = x @ wk_t + bk
    v = x @ wv_t + bv
    scores = jnp.einsum("bqd,bkd->bqk", q, k)
    weights = jax.nn.softmax(scores, axis=-1)
    return jnp.einsum("bqk,bkd->bqd", weights, v)


def attention_head_ref_bf16(x, wq_t, bq, wk_t, bk, wv_t, bv):
    """Reference with the same bf16-operand / f32-accumulate precision policy
    as the kernels (tight comparison target)."""
    xb = x.astype(jnp.bfloat16)

    def proj(w, b):
        return jnp.dot(xb, w.astype(jnp.bfloat16),
                       preferred_element_type=jnp.float32) + b

    q = proj(wq_t, bq).astype(jnp.bfloat16)
    k = proj(wk_t, bk).astype(jnp.bfloat16)
    v = proj(wv_t, bv).astype(jnp.bfloat16)
    scores = jnp.einsum("bqd,bkd->bqk", q, k,
                        preferred_element_type=jnp.float32)
    weights = jax.nn.softmax(scores, axis=-1)
    return jnp.einsum("bqk,bkd->bqd", weights.astype(jnp.bfloat16), v,
                      preferred_element_type=jnp.float32)


if __name__ == "__main__":
    B, S, E, H = 2, 8, 32, 16   # batch, seq, embed_dim, head_dim

    key = jax.random.PRNGKey(0)
    kx, kwq, kbq, kwk, kbk, kwv, kbv = jax.random.split(key, 7)

    # Deterministic parameter init (PyTorch-Linear-style uniform bound).
    bound = 1.0 / (E ** 0.5)
    x = jax.random.normal(kx, (B, S, E), dtype=jnp.float32)
    # Stored as [E, H] == W.T of a torch nn.Linear(E, H) weight [H, E].
    wq_t = jax.random.uniform(kwq, (E, H), jnp.float32, -bound, bound)
    wk_t = jax.random.uniform(kwk, (E, H), jnp.float32, -bound, bound)
    wv_t = jax.random.uniform(kwv, (E, H), jnp.float32, -bound, bound)
    bq = jax.random.uniform(kbq, (1, H), jnp.float32, -bound, bound)
    bk = jax.random.uniform(kbk, (1, H), jnp.float32, -bound, bound)
    bv = jax.random.uniform(kbv, (1, H), jnp.float32, -bound, bound)

    out = attention_head(x, wq_t, bq, wk_t, bk, wv_t, bv)
    out = jax.block_until_ready(out)
    assert out.shape == (B, S, H)

    # Tight check against a reference with the same bf16/f32 precision policy
    # (remaining delta: online-softmax reassociation + approx EUP reciprocal).
    ref_bf16 = attention_head_ref_bf16(x, wq_t, bq, wk_t, bk, wv_t, bv)
    assert jnp.allclose(out, ref_bf16, atol=1e-2, rtol=1e-2), \
        "mismatch vs bf16-precision reference"

    # Semantic sanity check against the pure-f32 reference (tolerance loosened
    # because the kernels intentionally use bf16 MXU operands).
    ref_f32 = attention_head_ref(x, wq_t, bq, wk_t, bk, wv_t, bv)
    assert jnp.allclose(out, ref_f32, atol=5e-2, rtol=5e-2), \
        "mismatch vs f32 reference"

    print("KERNEL_OK")
</pallas_src>

<mosaic_0001>
module attributes {stable_mosaic.version = 11 : i64} {
  func.func @_qkv_proj_kernel(%arg0: i32, %arg1: memref<16x32xbf16, #tpu.memory_space<vmem>>, %arg2: memref<32x384xbf16, #tpu.memory_space<vmem>>, %arg3: memref<1x384xf32, #tpu.memory_space<vmem>>, %arg4: memref<16x128xbf16, #tpu.memory_space<vmem>>, %arg5: memref<16x128xbf16, #tpu.memory_space<vmem>>, %arg6: memref<16x128xbf16, #tpu.memory_space<vmem>>) attributes {dimension_semantics = [#tpu.dimension_semantics<parallel>], iteration_bounds = array<i64: 1>, scalar_prefetch = 0 : i64, scratch_operands = 0 : i64, tpu.core_type = #tpu.core_type<tc>, window_params = [{transform_indices = @transform_0, window_bounds = array<i64: 16, 32>}, {pipeline_mode = #tpu.pipeline_mode<synchronous>, transform_indices = @transform_1, window_bounds = array<i64: 32, 384>}, {pipeline_mode = #tpu.pipeline_mode<synchronous>, transform_indices = @transform_2, window_bounds = array<i64: 1, 384>}, {transform_indices = @transform_3, window_bounds = array<i64: 16, 128>}, {transform_indices = @transform_4, window_bounds = array<i64: 16, 128>}, {transform_indices = @transform_5, window_bounds = array<i64: 16, 128>}]} {
    %c0 = arith.constant 0 : index
    %c0_0 = arith.constant 0 : index
    %0 = vector.load %arg1[%c0, %c0_0] : memref<16x32xbf16, #tpu.memory_space<vmem>>, vector<16x32xbf16>
    %c0_1 = arith.constant 0 : index
    %c0_2 = arith.constant 0 : index
    %1 = vector.load %arg2[%c0_1, %c0_2] : memref<32x384xbf16, #tpu.memory_space<vmem>>, vector<32x384xbf16>
    %cst = arith.constant dense<0.000000e+00> : vector<16x384xf32>
    %2 = tpu.matmul %0, %1, %cst {dimension_numbers = #tpu.dot_dimension_numbers<[1], [0], [0], [1], [0, 0, 1, 1], [], []>} : vector<16x32xbf16>, vector<32x384xbf16>, vector<16x384xf32> -> vector<16x384xf32>
    %c0_3 = arith.constant 0 : index
    %c0_4 = arith.constant 0 : index
    %3 = vector.load %arg3[%c0_3, %c0_4] : memref<1x384xf32, #tpu.memory_space<vmem>>, vector<1x384xf32>
    %4 = vector.broadcast %3 : vector<1x384xf32> to vector<16x384xf32>
    %5 = arith.addf %2, %4 : vector<16x384xf32>
    %6 = vector.extract_strided_slice %5 {offsets = [0, 0], sizes = [16, 128], strides = [1, 1]} : vector<16x384xf32> to vector<16x128xf32>
    %7 = arith.truncf %6 : vector<16x128xf32> to vector<16x128xbf16>
    %c0_5 = arith.constant 0 : index
    %c0_6 = arith.constant 0 : index
    %8 = vector.load %arg4[%c0_5, %c0_6] : memref<16x128xbf16, #tpu.memory_space<vmem>>, vector<16x128xbf16>
    tpu.vector_store %arg4[%c0_5, %c0_6], %7 {strides = array<i32>} : memref<16x128xbf16, #tpu.memory_space<vmem>>, vector<16x128xbf16>,
    %9 = vector.extract_strided_slice %5 {offsets = [0, 128], sizes = [16, 128], strides = [1, 1]} : vector<16x384xf32> to vector<16x128xf32>
    %10 = arith.truncf %9 : vector<16x128xf32> to vector<16x128xbf16>
    %c0_7 = arith.constant 0 : index
    %c0_8 = arith.constant 0 : index
    %11 = vector.load %arg5[%c0_7, %c0_8] : memref<16x128xbf16, #tpu.memory_space<vmem>>, vector<16x128xbf16>
    tpu.vector_store %arg5[%c0_7, %c0_8], %10 {strides = array<i32>} : memref<16x128xbf16, #tpu.memory_space<vmem>>, vector<16x128xbf16>,
    %12 = vector.extract_strided_slice %5 {offsets = [0, 256], sizes = [16, 128], strides = [1, 1]} : vector<16x384xf32> to vector<16x128xf32>
    %13 = arith.truncf %12 : vector<16x128xf32> to vector<16x128xbf16>
    %c0_9 = arith.constant 0 : index
    %c0_10 = arith.constant 0 : index
    %14 = vector.load %arg6[%c0_9, %c0_10] : memref<16x128xbf16, #tpu.memory_space<vmem>>, vector<16x128xbf16>
    tpu.vector_store %arg6[%c0_9, %c0_10], %13 {strides = array<i32>} : memref<16x128xbf16, #tpu.memory_space<vmem>>, vector<16x128xbf16>,
    return
  }
  func.func @transform_0(%arg0: i32) -> (i32, i32) {
    %c0_i32 = arith.constant 0 : i32
    %c0_i32_0 = arith.constant 0 : i32
    return %arg0, %c0_i32 : i32, i32
  }
  func.func @transform_1(%arg0: i32) -> (i32, i32) {
    %c0_i32 = arith.constant 0 : i32
    %c0_i32_0 = arith.constant 0 : i32
    %c0_i32_1 = arith.constant 0 : i32
    return %c0_i32, %c0_i32_0 : i32, i32
  }
  func.func @transform_2(%arg0: i32) -> (i32, i32) {
    %c0_i32 = arith.constant 0 : i32
    %c0_i32_0 = arith.constant 0 : i32
    %c0_i32_1 = arith.constant 0 : i32
    return %c0_i32, %c0_i32_0 : i32, i32
  }
  func.func @transform_3(%arg0: i32) -> (i32, i32) {
    %c0_i32 = arith.constant 0 : i32
    %c0_i32_0 = arith.constant 0 : i32
    return %arg0, %c0_i32 : i32, i32
  }
  func.func @transform_4(%arg0: i32) -> (i32, i32) {
    %c0_i32 = arith.constant 0 : i32
    %c0_i32_0 = arith.constant 0 : i32
    return %arg0, %c0_i32 : i32, i32
  }
  func.func @transform_5(%arg0: i32) -> (i32, i32) {
    %c0_i32 = arith.constant 0 : i32
    %c0_i32_0 = arith.constant 0 : i32
    return %arg0, %c0_i32 : i32, i32
  }
}

module attributes {stable_mosaic.version = 11 : i64} {
  func.func @_qkv_proj_kernel(%arg0: i32, %arg1: memref<16x32xbf16, #tpu.memory_space<vmem>>, %arg2: memref<32x384xbf16, #tpu.memory_space<vmem>>, %arg3: memref<1x384xf32, #tpu.memory_space<vmem>>, %arg4: memref<16x128xbf16, #tpu.memory_space<vmem>>, %arg5: memref<16x128xbf16, #tpu.memory_space<vmem>>, %arg6: memref<16x128xbf16, #tpu.memory_space<vmem>>) attributes {dimension_semantics = [#tpu.dimension_semantics<parallel>], iteration_bounds = array<i64: 1>, scalar_prefetch = 0 : i64, scratch_operands = 0 : i64, tpu.core_type = #tpu.core_type<tc>, window_params = [{transform_indices = @transform_0, window_bounds = array<i64: 16, 32>}, {pipeline_mode = #tpu.pipeline_mode<synchronous>, transform_indices = @transform_1, window_bounds = array<i64: 32, 384>}, {pipeline_mode = #tpu.pipeline_mode<synchronous>, transform_indices = @transform_2, window_bounds = array<i64: 1, 384>}, {transform_indices = @transform_3, window_bounds = array<i64: 16, 128>}, {transform_indices = @transform_4, window_bounds = array<i64: 16, 128>}, {transform_indices = @transform_5, window_bounds = array<i64: 16, 128>}]} {
    %c0 = arith.constant 0 : index
    %c0_0 = arith.constant 0 : index
    %0 = vector.load %arg1[%c0, %c0_0] : memref<16x32xbf16, #tpu.memory_space<vmem>>, vector<16x32xbf16>
    %c0_1 = arith.constant 0 : index
    %c0_2 = arith.constant 0 : index
    %1 = vector.load %arg2[%c0_1, %c0_2] : memref<32x384xbf16, #tpu.memory_space<vmem>>, vector<32x384xbf16>
    %cst = arith.constant dense<0.000000e+00> : vector<16x384xf32>
    %2 = tpu.matmul %0, %1, %cst {dimension_numbers = #tpu.dot_dimension_numbers<[1], [0], [0], [1], [0, 0, 1, 1], [], []>} : vector<16x32xbf16>, vector<32x384xbf16>, vector<16x384xf32> -> vector<16x384xf32>
    %c0_3 = arith.constant 0 : index
    %c0_4 = arith.constant 0 : index
    %3 = vector.load %arg3[%c0_3, %c0_4] : memref<1x384xf32, #tpu.memory_space<vmem>>, vector<1x384xf32>
    %4 = vector.broadcast %3 : vector<1x384xf32> to vector<16x384xf32>
    %5 = arith.addf %2, %4 : vector<16x384xf32>
    %6 = vector.extract_strided_slice %5 {offsets = [0, 0], sizes = [16, 128], strides = [1, 1]} : vector<16x384xf32> to vector<16x128xf32>
    %7 = arith.truncf %6 : vector<16x128xf32> to vector<16x128xbf16>
    %c0_5 = arith.constant 0 : index
    %c0_6 = arith.constant 0 : index
    %8 = vector.load %arg4[%c0_5, %c0_6] : memref<16x128xbf16, #tpu.memory_space<vmem>>, vector<16x128xbf16>
    tpu.vector_store %arg4[%c0_5, %c0_6], %7 {strides = array<i32>} : memref<16x128xbf16, #tpu.memory_space<vmem>>, vector<16x128xbf16>,
    %9 = vector.extract_strided_slice %5 {offsets = [0, 128], sizes = [16, 128], strides = [1, 1]} : vector<16x384xf32> to vector<16x128xf32>
    %10 = arith.truncf %9 : vector<16x128xf32> to vector<16x128xbf16>
    %c0_7 = arith.constant 0 : index
    %c0_8 = arith.constant 0 : index
    %11 = vector.load %arg5[%c0_7, %c0_8] : memref<16x128xbf16, #tpu.memory_space<vmem>>, vector<16x128xbf16>
    tpu.vector_store %arg5[%c0_7, %c0_8], %10 {strides = array<i32>} : memref<16x128xbf16, #tpu.memory_space<vmem>>, vector<16x128xbf16>,
    %12 = vector.extract_strided_slice %5 {offsets = [0, 256], sizes = [16, 128], strides = [1, 1]} : vector<16x384xf32> to vector<16x128xf32>
    %13 = arith.truncf %12 : vector<16x128xf32> to vector<16x128xbf16>
    %c0_9 = arith.constant 0 : index
    %c0_10 = arith.constant 0 : index
    %14 = vector.load %arg6[%c0_9, %c0_10] : memref<16x128xbf16, #tpu.memory_space<vmem>>, vector<16x128xbf16>
    tpu.vector_store %arg6[%c0_9, %c0_10], %13 {strides = array<i32>} : memref<16x128xbf16, #tpu.memory_space<vmem>>, vector<16x128xbf16>,
    return
  }
  func.func @transform_0(%arg0: i32) -> (i32, i32) {
    %c0_i32 = arith.constant 0 : i32
    %c0_i32_0 = arith.constant 0 : i32
    return %arg0, %c0_i32 : i32, i32
  }
  func.func @transform_1(%arg0: i32) -> (i32, i32) {
    %c0_i32 = arith.constant 0 : i32
    %c0_i32_0 = arith.constant 0 : i32
    %c0_i32_1 = arith.constant 0 : i32
    return %c0_i32, %c0_i32_0 : i32, i32
  }
  func.func @transform_2(%arg0: i32) -> (i32, i32) {
    %c0_i32 = arith.constant 0 : i32
    %c0_i32_0 = arith.constant 0 : i32
    %c0_i32_1 = arith.constant 0 : i32
    return %c0_i32, %c0_i32_0 : i32, i32
  }
  func.func @transform_3(%arg0: i32) -> (i32, i32) {
    %c0_i32 = arith.constant 0 : i32
    %c0_i32_0 = arith.constant 0 : i32
    return %arg0, %c0_i32 : i32, i32
  }
  func.func @transform_4(%arg0: i32) -> (i32, i32) {
    %c0_i32 = arith.constant 0 : i32
    %c0_i32_0 = arith.constant 0 : i32
    return %arg0, %c0_i32 : i32, i32
  }
  func.func @transform_5(%arg0: i32) -> (i32, i32) {
    %c0_i32 = arith.constant 0 : i32
    %c0_i32_0 = arith.constant 0 : i32
    return %arg0, %c0_i32 : i32, i32
  }
}

</mosaic_0001>

<bundles_post_ra>
// kernel: tpu_custom_call.1
= control target key start
LH: loop header
LB: loop body
LE: loop exit
PB: predicated region body
PF: predicated region fallthrough
CT: control target
= control target key end

     0   :  { %11 = vsyncpa [#allocation3], 0  ;;  %s518_s0 = inlined_call_operand.hbm [shape: bf16[16,32], index: 0, kind: input, shape index: {}]   ;;  %s519_s1 = inlined_call_operand.hbm [shape: bf16[32,384], index: 1, kind: input, shape index: {}]   ;;  %s520_s2 = inlined_call_operand.hbm [shape: f32[1,384], index: 2, kind: input, shape index: {}]   ;;  %s521_s3 = inlined_call_operand.hbm [shape: bf16[16,128], index: 3, kind: output, shape index: {0}]   ;;  %s522_s4 = inlined_call_operand.hbm [shape: bf16[16,128], index: 4, kind: output, shape index: {1}]   ;;  %s523_s5 = inlined_call_operand.hbm [shape: bf16[16,128], index: 5, kind: output, shape index: {2}]  }
   0x1   :  { %12 = vsyncpa [#allocation6], 0 }
   0x2   :  { %13 = vsyncpa [#allocation4], 0  ;;  %s32_s20 = sshll.u32 %s519_s1, 4  ;;  %s33_s20 = int_to_ptr.hbm [resolvable:$true] %s32_s20 }
   0x3   :  { %14 = vsyncpa [#allocation10], 0  ;;  %s448_s21 = smov [#allocation5]   ;;  %s19_s25 = sshll.u32 %s518_s0, 4  ;;  %s20_s25 = int_to_ptr.hbm [resolvable:$true] %s19_s25 }
   0x4   :  { %s34_s22 = sshll.u32 %s448_s21, 4  ;;  %s449_s26 = smov 192   ;;  %s35_s22 = int_to_ptr.vmem [resolvable:$true] %s34_s22 }
   0x5   :  { %s450_s27 = smov 12   ;;  %s451_s28 = smov [#allocation2]  }
   0x6   :  { %40 = dma.hbm_to_vmem [thread:$0]  %s33_s20, 768, %s35_s22, [#allocation6], %s449_s26, %s449_s26, %s450_s27  }
   0x7   :  { %s21_s29 = sshll.u32 %s451_s28, 4  ;;  %s452_s30 = smov 64   ;;  %s22_s29 = int_to_ptr.vmem [resolvable:$true] %s21_s29 }
   0x8   :  { %s453_s6 = smov 4   ;;  %s46_s8 = sshll.u32 %s520_s2, 4  ;;  %s47_s8 = int_to_ptr.hbm [resolvable:$true] %s46_s8 }
   0x9   :  { %27 = dma.hbm_to_vmem [thread:$0]  %s20_s25, 128, %s22_s29, [#allocation3], %s452_s30, %s452_s30, %s453_s6  }
   0xa   :  { %s454_s9 = smov [#allocation7]  }
   0xb   :  { %s48_s0 = sshll.u32 %s454_s9, 4  ;;  %s49_s0 = int_to_ptr.vmem [resolvable:$true] %s48_s0 }
   0xc   :  { %51 = dma.hbm_to_vmem [thread:$0]  %s47_s8, 48, %s49_s0, [#allocation6]  }
   0xd   :  { %440 = dma.done.wait [#allocation3], 128  }
   0xe   :  { %441 = vsyncadd [#allocation3], 4294967168 }
   0xf   :  { %442 = dma.done.wait [#allocation6], 816  }
  0x10   :  { %443 = vsyncadd [#allocation6], 4294966480  ;;  %v251_v0 = vld [vmem:[#allocation5 + $0x18] sm:$0xf]  ;;  %v269_v1 = vld [vmem:[#allocation5 + $0x20] sm:$0xf0] }
  0x11   :  { %v268_v2 = vld [vmem:[#allocation5 + $0x1c] sm:$0xf]  ;;  %v252_v3 = vor.u32 %v269_v1, %v251_v0  ;;  %v253_v4 = vld [vmem:[#allocation5 + $0x24] sm:$0xf0]  ;;  %v259_v5 = vld [vmem:[#allocation5 + $0x20] sm:$0xf] }
  0x12   :  { %v270_v6 = vld [vmem:[#allocation5 + $0x28] sm:$0xf0]  ;;  %v256_v7 = vor.u32 %v268_v2, %v253_v4  ;;  %v239_v9 = vld [vmem:[#allocation5] sm:$0xf]  ;;  %v265_v11 = vld [vmem:[#allocation5 + $0x4] sm:$0xf] }
  0x13   :  { %v260_v8 = vor.u32 %v270_v6, %v259_v5  ;;  %v266_v10 = vld [vmem:[#allocation5 + $0x8] sm:$0xf0]  ;;  %130 = vmatpush.bf16.msra.mxu0 %v252_v3  ;;  %v241_v13 = vld [vmem:[#allocation5 + $0xc] sm:$0xf0]  ;;  %v247_v14 = vld [vmem:[#allocation5 + $0x8] sm:$0xf] }
  0x14   :  { %v240_v12 = vor.u32 %v266_v10, %v239_v9  ;;  %v267_v15 = vld [vmem:[#allocation5 + $0x10] sm:$0xf0]  ;;  %144 = vmatpush.bf16.msra.mxu1 %v256_v7  ;;  %v244_v16 = vor.u32 %v265_v11, %v241_v13  ;;  %v264_v18 = vld [vmem:[#allocation2] sm:$0xff]  ;;  %vm120_vm0 = vcmask 261120   ;;  %v75_v21 = vld [vmem:[#allocation7] sm:$0x7] }
  0x15   :  { %158 = vmatpush.bf16.msra.mxu2 %v260_v8  ;;  %v248_v17 = vor.u32 %v267_v15, %v247_v14  ;;  %v77_v22 = vperm.slane %v75_v21, 0  ;;  %v78_v23 = vperm.slane %v75_v21, 1  ;;  %s455_s2 = smov [#allocation8]   ;;  %s184_s13 = sshll.u32 %s521_s3, 4  ;;  %v79_v32 = vperm.slane %v75_v21, 2  ;;  %s185_s13 = int_to_ptr.hbm [resolvable:$true] %s184_s13 }
  0x16   :  { %s182_s10 = sshll.u32 %s455_s2, 4  ;;  %s456_s14 = smov [#allocation9]   ;;  %s183_s10 = int_to_ptr.vmem [resolvable:$true] %s182_s10 }
  0x17   :  { %131 = vmatpush.bf16.msra.mxu0 %v240_v12  ;;  %s195_s15 = sshll.u32 %s456_s14, 4  ;;  %s197_s18 = sshll.u32 %s522_s4, 4  ;;  %s196_s15 = int_to_ptr.vmem [resolvable:$true] %s195_s15  ;;  %s198_s18 = int_to_ptr.hbm [resolvable:$true] %s197_s18 }
  0x18   :  { %145 = vmatpush.bf16.msra.mxu1 %v244_v16  ;;  %s457_s3 = smov [#allocation11]   ;;  %s210_s22 = sshll.u32 %s523_s5, 4  ;;  %s211_s22 = int_to_ptr.hbm [resolvable:$true] %s210_s22 }
  0x19   :  { %159 = vmatpush.bf16.msra.mxu2 %v248_v17  ;;  %s208_s19 = sshll.u32 %s457_s3, 4  ;;  %s209_s19 = int_to_ptr.vmem [resolvable:$true] %s208_s19 }
  0x1a   :  { %261 = vmatmul.msk.bf16.vlgmr.msra.gmra.mxu0 %vm120_vm0, %v264_v18 }
  0x1b   :  { %262 = vmatmul.msk.bf16.vlgmr.msra.gmra.mxu1 %vm120_vm0, %v264_v18 }
  0x1c   :  { %263 = vmatmul.msk.bf16.vlgmr.msra.gmra.mxu2 %vm120_vm0, %v264_v18 }
  0x97   :  { %v133_v19 = vpop.f32.mrf.mxu0 }
  0x98   :  { %v147_v20 = vpop.f32.mrf.mxu1  ;;  %v134_v26 = vadd.f32 %v133_v19, %v77_v22 }
  0x99   :  { %v148_v29 = vadd.f32 %v147_v20, %v78_v23 }
  0x9f   :  { %v161_v24 = vpop.f32.mrf.mxu2  ;;  %v135_v25 = vpop.f32.mrf.mxu0 }
  0xa0   :  { %v136_v27 = vadd.f32 %v135_v25, %v77_v22  ;;  %v149_v28 = vpop.f32.mrf.mxu1  ;;  %v162_v35 = vadd.f32 %v161_v24, %v79_v32 }
  0xa1   :  { %v150_v30 = vadd.f32 %v149_v28, %v78_v23 }
  0xa2   :  { %v274_v31 = vpack.c.bf16 %v136_v27, %v134_v26 }
  0xa3   :  { %v279_v33 = vpack.c.bf16 %v150_v30, %v148_v29 }
  0xa4   :  { %275 = vst [vmem:[#allocation8] sm:$0xff] %v274_v31  }
  0xa5   :  { %280 = vst [vmem:[#allocation9] sm:$0xff] %v279_v33   ;;  %190 = dma.vmem_to_hbm [thread:$0]  %s183_s10, 128, %s185_s13, [#allocation4], %s452_s30, %s452_s30, %s453_s6  }
  0xa6   :  { %203 = dma.vmem_to_hbm [thread:$0]  %s196_s15, 128, %s198_s18, [#allocation10], %s452_s30, %s452_s30, %s453_s6  }
  0xa7   :  { %v163_v34 = vpop.f32.mrf.mxu2 }
  0xa8   :  { %v164_v36 = vadd.f32 %v163_v34, %v79_v32 }
  0xaa   :  { %v284_v37 = vpack.c.bf16 %v164_v36, %v162_v35 }
  0xac   :  { %285 = vst [vmem:[#allocation11] sm:$0xff] %v284_v37  }
  0xad   :  { %216 = dma.vmem_to_hbm [thread:$0]  %s209_s19, 128, %s211_s22, [#allocation10], %s452_s30, %s452_s30, %s453_s6  }
  0xae   :  { %444 = dma.done.wait [#allocation4], 128  }
  0xaf   :  { %445 = vsyncadd [#allocation4], 4294967168 }
  0xb0   :  { %446 = dma.done.wait [#allocation10], 256  }
  0xb1   :  { %447 = vsyncadd [#allocation10], 4294967040 }
  0xb2   :  { %229 = vsyncpa [#allocation3], 1 }
  0xb3   :  { %230 = vsyncpa [#allocation6], 1 }
  0xb4   :  { %231 = vsyncpa [#allocation4], 1 }
  0xb5   :  { %232 = vsyncpa [#allocation10], 1 }

// kernel: tpu_custom_call.1
= control target key start
LH: loop header
LB: loop body
LE: loop exit
PB: predicated region body
PF: predicated region fallthrough
CT: control target
= control target key end

     0   :  { %11 = vsyncpa [#allocation3], 0  ;;  %s518_s0 = inlined_call_operand.hbm [shape: bf16[16,32], index: 0, kind: input, shape index: {}]   ;;  %s519_s1 = inlined_call_operand.hbm [shape: bf16[32,384], index: 1, kind: input, shape index: {}]   ;;  %s520_s2 = inlined_call_operand.hbm [shape: f32[1,384], index: 2, kind: input, shape index: {}]   ;;  %s521_s3 = inlined_call_operand.hbm [shape: bf16[16,128], index: 3, kind: output, shape index: {0}]   ;;  %s522_s4 = inlined_call_operand.hbm [shape: bf16[16,128], index: 4, kind: output, shape index: {1}]   ;;  %s523_s5 = inlined_call_operand.hbm [shape: bf16[16,128], index: 5, kind: output, shape index: {2}]  }
   0x1   :  { %12 = vsyncpa [#allocation6], 0 }
   0x2   :  { %13 = vsyncpa [#allocation4], 0  ;;  %s32_s20 = sshll.u32 %s519_s1, 4  ;;  %s33_s20 = int_to_ptr.hbm [resolvable:$true] %s32_s20 }
   0x3   :  { %14 = vsyncpa [#allocation10], 0  ;;  %s448_s21 = smov [#allocation5]   ;;  %s19_s25 = sshll.u32 %s518_s0, 4  ;;  %s20_s25 = int_to_ptr.hbm [resolvable:$true] %s19_s25 }
   0x4   :  { %s34_s22 = sshll.u32 %s448_s21, 4  ;;  %s449_s26 = smov 192   ;;  %s35_s22 = int_to_ptr.vmem [resolvable:$true] %s34_s22 }
   0x5   :  { %s450_s27 = smov 12   ;;  %s451_s28 = smov [#allocation2]  }
   0x6   :  { %40 = dma.hbm_to_vmem [thread:$0]  %s33_s20, 768, %s35_s22, [#allocation6], %s449_s26, %s449_s26, %s450_s27  }
   0x7   :  { %s21_s29 = sshll.u32 %s451_s28, 4  ;;  %s452_s30 = smov 64   ;;  %s22_s29 = int_to_ptr.vmem [resolvable:$true] %s21_s29 }
   0x8   :  { %s453_s6 = smov 4   ;;  %s46_s8 = sshll.u32 %s520_s2, 4  ;;  %s47_s8 = int_to_ptr.hbm [resolvable:$true] %s46_s8 }
   0x9   :  { %27 = dma.hbm_to_vmem [thread:$0]  %s20_s25, 128, %s22_s29, [#allocation3], %s452_s30, %s452_s30, %s453_s6  }
   0xa   :  { %s454_s9 = smov [#allocation7]  }
   0xb   :  { %s48_s0 = sshll.u32 %s454_s9, 4  ;;  %s49_s0 = int_to_ptr.vmem [resolvable:$true] %s48_s0 }
   0xc   :  { %51 = dma.hbm_to_vmem [thread:$0]  %s47_s8, 48, %s49_s0, [#allocation6]  }
   0xd   :  { %440 = dma.done.wait [#allocation3], 128  }
   0xe   :  { %441 = vsyncadd [#allocation3], 4294967168 }
   0xf   :  { %442 = dma.done.wait [#allocation6], 816  }
  0x10   :  { %443 = vsyncadd [#allocation6], 4294966480  ;;  %v251_v0 = vld [vmem:[#allocation5 + $0x18] sm:$0xf]  ;;  %v269_v1 = vld [vmem:[#allocation5 + $0x20] sm:$0xf0] }
  0x11   :  { %v268_v2 = vld [vmem:[#allocation5 + $0x1c] sm:$0xf]  ;;  %v252_v3 = vor.u32 %v269_v1, %v251_v0  ;;  %v253_v4 = vld [vmem:[#allocation5 + $0x24] sm:$0xf0]  ;;  %v259_v5 = vld [vmem:[#allocation5 + $0x20] sm:$0xf] }
  0x12   :  { %v270_v6 = vld [vmem:[#allocation5 + $0x28] sm:$0xf0]  ;;  %v256_v7 = vor.u32 %v268_v2, %v253_v4  ;;  %v239_v9 = vld [vmem:[#allocation5] sm:$0xf]  ;;  %v265_v11 = vld [vmem:[#allocation5 + $0x4] sm:$0xf] }
  0x13   :  { %v260_v8 = vor.u32 %v270_v6, %v259_v5  ;;  %v266_v10 = vld [vmem:[#allocation5 + $0x8] sm:$0xf0]  ;;  %130 = vmatpush.bf16.msra.mxu0 %v252_v3  ;;  %v241_v13 = vld [vmem:[#allocation5 + $0xc] sm:$0xf0]  ;;  %v247_v14 = vld [vmem:[#allocation5 + $0x8] sm:$0xf] }
  0x14   :  { %v240_v12 = vor.u32 %v266_v10, %v239_v9  ;;  %v267_v15 = vld [vmem:[#allocation5 + $0x10] sm:$0xf0]  ;;  %144 = vmatpush.bf16.msra.mxu1 %v256_v7  ;;  %v244_v16 = vor.u32 %v265_v11, %v241_v13  ;;  %v264_v18 = vld [vmem:[#allocation2] sm:$0xff]  ;;  %vm120_vm0 = vcmask 261120   ;;  %v75_v21 = vld [vmem:[#allocation7] sm:$0x7] }
  0x15   :  { %158 = vmatpush.bf16.msra.mxu2 %v260_v8  ;;  %v248_v17 = vor.u32 %v267_v15, %v247_v14  ;;  %v77_v22 = vperm.slane %v75_v21, 0  ;;  %v78_v23 = vperm.slane %v75_v21, 1  ;;  %s455_s2 = smov [#allocation8]   ;;  %s184_s13 = sshll.u32 %s521_s3, 4  ;;  %v79_v32 = vperm.slane %v75_v21, 2  ;;  %s185_s13 = int_to_ptr.hbm [resolvable:$true] %s184_s13 }
  0x16   :  { %s182_s10 = sshll.u32 %s455_s2, 4  ;;  %s456_s14 = smov [#allocation9]   ;;  %s183_s10 = int_to_ptr.vmem [resolvable:$true] %s182_s10 }
  0x17   :  { %131 = vmatpush.bf16.msra.mxu0 %v240_v12  ;;  %s195_s15 = sshll.u32 %s456_s14, 4  ;;  %s197_s18 = sshll.u32 %s522_s4, 4  ;;  %s196_s15 = int_to_ptr.vmem [resolvable:$true] %s195_s15  ;;  %s198_s18 = int_to_ptr.hbm [resolvable:$true] %s197_s18 }
  0x18   :  { %145 = vmatpush.bf16.msra.mxu1 %v244_v16  ;;  %s457_s3 = smov [#allocation11]   ;;  %s210_s22 = sshll.u32 %s523_s5, 4  ;;  %s211_s22 = int_to_ptr.hbm [resolvable:$true] %s210_s22 }
  0x19   :  { %159 = vmatpush.bf16.msra.mxu2 %v248_v17  ;;  %s208_s19 = sshll.u32 %s457_s3, 4  ;;  %s209_s19 = int_to_ptr.vmem [resolvable:$true] %s208_s19 }
  0x1a   :  { %261 = vmatmul.msk.bf16.vlgmr.msra.gmra.mxu0 %vm120_vm0, %v264_v18 }
  0x1b   :  { %262 = vmatmul.msk.bf16.vlgmr.msra.gmra.mxu1 %vm120_vm0, %v264_v18 }
  0x1c   :  { %263 = vmatmul.msk.bf16.vlgmr.msra.gmra.mxu2 %vm120_vm0, %v264_v18 }
  0x97   :  { %v133_v19 = vpop.f32.mrf.mxu0 }
  0x98   :  { %v147_v20 = vpop.f32.mrf.mxu1  ;;  %v134_v26 = vadd.f32 %v133_v19, %v77_v22 }
  0x99   :  { %v148_v29 = vadd.f32 %v147_v20, %v78_v23 }
  0x9f   :  { %v161_v24 = vpop.f32.mrf.mxu2  ;;  %v135_v25 = vpop.f32.mrf.mxu0 }
  0xa0   :  { %v136_v27 = vadd.f32 %v135_v25, %v77_v22  ;;  %v149_v28 = vpop.f32.mrf.mxu1  ;;  %v162_v35 = vadd.f32 %v161_v24, %v79_v32 }
  0xa1   :  { %v150_v30 = vadd.f32 %v149_v28, %v78_v23 }
  0xa2   :  { %v274_v31 = vpack.c.bf16 %v136_v27, %v134_v26 }
  0xa3   :  { %v279_v33 = vpack.c.bf16 %v150_v30, %v148_v29 }
  0xa4   :  { %275 = vst [vmem:[#allocation8] sm:$0xff] %v274_v31  }
  0xa5   :  { %280 = vst [vmem:[#allocation9] sm:$0xff] %v279_v33   ;;  %190 = dma.vmem_to_hbm [thread:$0]  %s183_s10, 128, %s185_s13, [#allocation4], %s452_s30, %s452_s30, %s453_s6  }
  0xa6   :  { %203 = dma.vmem_to_hbm [thread:$0]  %s196_s15, 128, %s198_s18, [#allocation10], %s452_s30, %s452_s30, %s453_s6  }
  0xa7   :  { %v163_v34 = vpop.f32.mrf.mxu2 }
  0xa8   :  { %v164_v36 = vadd.f32 %v163_v34, %v79_v32 }
  0xaa   :  { %v284_v37 = vpack.c.bf16 %v164_v36, %v162_v35 }
  0xac   :  { %285 = vst [vmem:[#allocation11] sm:$0xff] %v284_v37  }
  0xad   :  { %216 = dma.vmem_to_hbm [thread:$0]  %s209_s19, 128, %s211_s22, [#allocation10], %s452_s30, %s452_s30, %s453_s6  }
  0xae   :  { %444 = dma.done.wait [#allocation4], 128  }
  0xaf   :  { %445 = vsyncadd [#allocation4], 4294967168 }
  0xb0   :  { %446 = dma.done.wait [#allocation10], 256  }
  0xb1   :  { %447 = vsyncadd [#allocation10], 4294967040 }
  0xb2   :  { %229 = vsyncpa [#allocation3], 1 }
  0xb3   :  { %230 = vsyncpa [#allocation6], 1 }
  0xb4   :  { %231 = vsyncpa [#allocation4], 1 }
  0xb5   :  { %232 = vsyncpa [#allocation10], 1 }

</bundles_post_ra>
